<compile_context>
chip_gen: v5e
topology: v5e:2x2
jax: 0.10.0
libtpu: 0.0.40
codegen_flags: <defaults>
</compile_context>

<pallas_src>
import functools

import jax
import jax.numpy as jnp
from jax.experimental import pallas as pl
from jax.experimental.pallas import tpu as pltpu


def _soft_bootstrap_kernel(logits_ref, target_ref, out_ref, *, beta):
    # logits_ref: (bn, C) float, target_ref: (bn, 1) int32, out_ref: (bn, 1) f32
    x = logits_ref[...].astype(jnp.float32)                      # (bn, C)
    t = target_ref[...]                                          # (bn, 1)

    m = jnp.max(x, axis=-1, keepdims=True)                       # (bn, 1)  XLU
    shifted = x - m                                               # (bn, C)  VPU
    e = jnp.exp(shifted)                                          # (bn, C)  EUP
    s = jnp.sum(e, axis=-1, keepdims=True)                        # (bn, 1)  XLU
    es = jnp.sum(e * shifted, axis=-1, keepdims=True)             # (bn, 1)  XLU
    lse = jnp.log(s)                                              # (bn, 1)  EUP

    # gather shifted at the target class via a one-hot mask (no dyn indexing)
    col = jax.lax.broadcasted_iota(jnp.int32, x.shape, 1)         # (bn, C)
    shifted_t = jnp.sum(jnp.where(col == t, shifted, 0.0),
                        axis=-1, keepdims=True)                   # (bn, 1)  XLU

    ce = lse - shifted_t                                          # cross-entropy
    neg_ent = es / s - lse                                        # sum_c p*logp (<= 0)
    out_ref[...] = beta * ce - (1.0 - beta) * neg_ent


def _round_up(x, m):
    return ((x + m - 1) // m) * m


def _pick_block_n(n, c, in_itemsize, vmem_limit_bytes):
    # Budget: double-buffered input block (2*bn*C*itemsize) plus ~3 live f32
    # (bn, C) temporaries in the kernel body; leave a few MiB of headroom.
    budget = max(4 << 20, vmem_limit_bytes - (8 << 20))
    per_row = c * (2 * in_itemsize + 3 * 4)
    bn = budget // per_row
    bn = min(int(bn), 1024, _round_up(n, 8))
    bn = max(8, (bn // 8) * 8)
    return bn


def soft_bootstrapping_loss(logits, targets, *, beta=0.95, reduce=True,
                            block_n=None):
    """logits: (N, C) float array (f32 or bf16); targets: (N,) integer class ids."""
    n, c = logits.shape
    in_itemsize = jnp.dtype(logits.dtype).itemsize

    # Per-generation VMEM budget: ~3/4 of physical, capped at 100 MiB
    # (v5e/v6e -> ~96 MiB, v7x -> ~48 MiB).
    try:
        phys_vmem = pltpu.get_tpu_info().vmem_capacity_bytes
    except Exception:  # conservative fallback if the query is unavailable
        phys_vmem = 64 << 20
    vmem_limit = int(min(phys_vmem * 3 // 4, 100 << 20))

    if block_n is None:
        block_n = _pick_block_n(n, c, in_itemsize, vmem_limit)
    else:
        block_n = max(8, (min(block_n, _round_up(n, 8)) // 8) * 8)

    targets_2d = targets.astype(jnp.int32).reshape(n, 1)
    num_blocks = pl.cdiv(n, block_n)  # last block may be partial; OOB rows dropped

    cost = pl.CostEstimate(
        flops=8 * n * c,
        transcendentals=n * c + 2 * n,
        bytes_accessed=n * c * in_itemsize + 2 * n * 4,
    )

    per_sample = pl.pallas_call(
        functools.partial(_soft_bootstrap_kernel, beta=float(beta)),
        out_shape=jax.ShapeDtypeStruct((n, 1), jnp.float32),
        grid_spec=pltpu.PrefetchScalarGridSpec(
            num_scalar_prefetch=0,
            grid=(num_blocks,),
            in_specs=[
                pl.BlockSpec((block_n, c), lambda i: (i, 0)),
                pl.BlockSpec((block_n, 1), lambda i: (i, 0)),
            ],
            out_specs=pl.BlockSpec((block_n, 1), lambda i: (i, 0)),
        ),
        compiler_params=pltpu.CompilerParams(
            dimension_semantics=("parallel",),
            vmem_limit_bytes=vmem_limit,
        ),
        cost_estimate=cost,
    )(logits, targets_2d)

    per_sample = per_sample.reshape(-1)
    if reduce:
        # TODO(synk): mean kept in the wrapper so the row grid axis stays
        # "parallel" (megacore sharding on v7x); fuse into the kernel only if
        # the extra launch ever shows up in profiles.
        return jnp.mean(per_sample)
    return per_sample


def _reference(logits, targets, beta=0.95, reduce=True):
    # pure-JAX reference mirroring the PyTorch forward
    logits = logits.astype(jnp.float32)
    logp = jax.nn.log_softmax(logits, axis=1)
    p = jax.nn.softmax(logits, axis=1)
    ce = -jnp.take_along_axis(
        logp, targets.reshape(-1, 1).astype(jnp.int32), axis=1).reshape(-1)
    bootstrap = -(1.0 - beta) * jnp.sum(p * logp, axis=1)
    out = beta * ce + bootstrap
    return jnp.mean(out) if reduce else out


if __name__ == "__main__":
    key = jax.random.PRNGKey(0)
    k1, k2 = jax.random.split(key)

    N, C = 16, 128  # small batch, lane-dense class axis
    logits = jax.random.normal(k1, (N, C), dtype=jnp.float32) * 2.0
    targets = jax.random.randint(k2, (N,), 0, C, dtype=jnp.int32)

    out = soft_bootstrapping_loss(logits, targets, beta=0.95, reduce=True)
    out = jax.block_until_ready(out)
    ref = _reference(logits, targets, beta=0.95, reduce=True)
    assert jnp.allclose(out, ref, atol=2e-5, rtol=2e-5), (out, ref)

    # unreduced path
    out_vec = jax.block_until_ready(
        soft_bootstrapping_loss(logits, targets, beta=0.95, reduce=False))
    ref_vec = _reference(logits, targets, beta=0.95, reduce=False)
    assert jnp.allclose(out_vec, ref_vec, atol=2e-5, rtol=2e-5)

    # non-divisible batch (exercises the pl.cdiv grid / dropped-OOB-rows path)
    N2 = 12
    logits2 = jax.random.normal(k1, (N2, C), dtype=jnp.float32)
    targets2 = jax.random.randint(k2, (N2,), 0, C, dtype=jnp.int32)
    out2 = jax.block_until_ready(
        soft_bootstrapping_loss(logits2, targets2, beta=0.95, reduce=True,
                                block_n=8))
    ref2 = _reference(logits2, targets2, beta=0.95, reduce=True)
    assert jnp.allclose(out2, ref2, atol=2e-5, rtol=2e-5), (out2, ref2)

    print("KERNEL_OK")
</pallas_src>

<mosaic_0001>
module attributes {stable_mosaic.version = 11 : i64} {
  func.func @_soft_bootstrap_kernel(%arg0: i32, %arg1: memref<16x128xf32, #tpu.memory_space<vmem>>, %arg2: memref<16x1xi32, #tpu.memory_space<vmem>>, %arg3: memref<16x1xf32, #tpu.memory_space<vmem>>) attributes {dimension_semantics = [#tpu.dimension_semantics<parallel>], iteration_bounds = array<i64: 1>, scalar_prefetch = 0 : i64, scratch_operands = 0 : i64, tpu.core_type = #tpu.core_type<tc>, window_params = [{transform_indices = @transform_0, window_bounds = array<i64: 16, 128>}, {transform_indices = @transform_1, window_bounds = array<i64: 16, 1>}, {transform_indices = @transform_2, window_bounds = array<i64: 16, 1>}]} {
    %c0 = arith.constant 0 : index
    %c0_0 = arith.constant 0 : index
    %0 = vector.load %arg1[%c0, %c0_0] : memref<16x128xf32, #tpu.memory_space<vmem>>, vector<16x128xf32>
    %c0_1 = arith.constant 0 : index
    %c0_2 = arith.constant 0 : index
    %1 = vector.load %arg2[%c0_1, %c0_2] : memref<16x1xi32, #tpu.memory_space<vmem>>, vector<16x1xi32>
    %cst = arith.constant dense<0xFF800000> : vector<16xf32>
    %2 = vector.multi_reduction <maximumf>, %0, %cst [1] : vector<16x128xf32> to vector<16xf32>
    %3 = vector.shape_cast %2 : vector<16xf32> to vector<16x1xf32>
    %4 = vector.broadcast %3 : vector<16x1xf32> to vector<16x128xf32>
    %5 = arith.subf %0, %4 : vector<16x128xf32>
    %6 = math.exp %5 : vector<16x128xf32>
    %cst_3 = arith.constant dense<0.000000e+00> : vector<16xf32>
    %7 = vector.multi_reduction <add>, %6, %cst_3 [1] : vector<16x128xf32> to vector<16xf32>
    %8 = vector.shape_cast %7 : vector<16xf32> to vector<16x1xf32>
    %9 = arith.mulf %6, %5 : vector<16x128xf32>
    %cst_4 = arith.constant dense<0.000000e+00> : vector<16xf32>
    %10 = vector.multi_reduction <add>, %9, %cst_4 [1] : vector<16x128xf32> to vector<16xf32>
    %11 = vector.shape_cast %10 : vector<16xf32> to vector<16x1xf32>
    %12 = math.log %8 : vector<16x1xf32>
    %13 = tpu.iota {dimensions = array<i32: 1>} : vector<16x128xi32>
    %14 = vector.broadcast %1 : vector<16x1xi32> to vector<16x128xi32>
    %15 = arith.cmpi eq, %13, %14 : vector<16x128xi32>
    %cst_5 = arith.constant 0.000000e+00 : f32
    %16 = vector.broadcast %cst_5 : f32 to vector<16x128xf32>
    %17 = arith.select %15, %5, %16 : vector<16x128xi1>, vector<16x128xf32>
    %cst_6 = arith.constant dense<0.000000e+00> : vector<16xf32>
    %18 = vector.multi_reduction <add>, %17, %cst_6 [1] : vector<16x128xf32> to vector<16xf32>
    %19 = vector.shape_cast %18 : vector<16xf32> to vector<16x1xf32>
    %20 = arith.subf %12, %19 : vector<16x1xf32>
    %21 = arith.divf %11, %8 : vector<16x1xf32>
    %22 = arith.subf %21, %12 : vector<16x1xf32>
    %cst_7 = arith.constant 0.949999988 : f32
    %23 = vector.broadcast %cst_7 : f32 to vector<16x1xf32>
    %24 = arith.mulf %23, %20 : vector<16x1xf32>
    %cst_8 = arith.constant 5.000000e-02 : f32
    %25 = vector.broadcast %cst_8 : f32 to vector<16x1xf32>
    %26 = arith.mulf %25, %22 : vector<16x1xf32>
    %27 = arith.subf %24, %26 : vector<16x1xf32>
    %c0_9 = arith.constant 0 : index
    %c0_10 = arith.constant 0 : index
    %28 = vector.load %arg3[%c0_9, %c0_10] : memref<16x1xf32, #tpu.memory_space<vmem>>, vector<16x1xf32>
    tpu.vector_store %arg3[%c0_9, %c0_10], %27 {strides = array<i32>} : memref<16x1xf32, #tpu.memory_space<vmem>>, vector<16x1xf32>,
    return
  }
  func.func @transform_0(%arg0: i32) -> (i32, i32) {
    %c0_i32 = arith.constant 0 : i32
    %c0_i32_0 = arith.constant 0 : i32
    return %arg0, %c0_i32 : i32, i32
  }
  func.func @transform_1(%arg0: i32) -> (i32, i32) {
    %c0_i32 = arith.constant 0 : i32
    %c0_i32_0 = arith.constant 0 : i32
    return %arg0, %c0_i32 : i32, i32
  }
  func.func @transform_2(%arg0: i32) -> (i32, i32) {
    %c0_i32 = arith.constant 0 : i32
    %c0_i32_0 = arith.constant 0 : i32
    return %arg0, %c0_i32 : i32, i32
  }
}

</mosaic_0001>

<bundles_post_ra>
// kernel: tpu_custom_call.1
= control target key start
LH: loop header
LB: loop body
LE: loop exit
PB: predicated region body
PF: predicated region fallthrough
CT: control target
= control target key end

     0   :  { %v117_v1 = vmov 0   ;;  %v39_v13 = vlaneseq  ;;  %vm95_vm9 = vcmask 7168   ;;  %s151_s0 = inlined_call_operand.vmem [shape: f32[16,128], index: 0, kind: input, shape index: {}]   ;;  %s152_s1 = inlined_call_operand.vmem [shape: s32[16,1], index: 1, kind: input, shape index: {}]   ;;  %s153_s2 = inlined_call_operand.vmem [shape: f32[16,1], index: 2, kind: output, shape index: {}]  }
   0x1   :  { %v11_v0 = vld [vmem:[%s151_s0] sm:$0xff]  ;;  %103 = vset.pattern.permute.xlu1 %v117_v1  ;;  %104 = vset.pattern.permute.xlu0 %v117_v1  ;;  %v12_v3 = vld [vmem:[%s151_s0 + $0x8] sm:$0xff] }
   0x2   :  { %v13_v2 = vld [vmem:[%s152_s1] sm:$0xff]  ;;  %15 = vmax.xlane.f32.xlu0 %v11_v0  ;;  %v14_v4 = vld [vmem:[%s152_s1 + $0x8] sm:$0xff]  ;;  %v40_v16 = vand.u32 127, %v39_v13 }
   0x3   :  { %42 = vperm.xlu1 %103, %v13_v2  }
   0xa   :  { %17 = vmax.xlane.f32.xlu0 %v12_v3 }
   0xb   :  { %45 = vperm.xlu1 %103, %v14_v4  }
  0x75   :  { %v16_v5 = vpop.xlane.xlu0 %15  ;;  %v43_v8 = vpop.permute.xlu1 %42 }
  0x76   :  { %v19_v6 = vsub.f32 %v11_v0, %v16_v5  ;;  %vm47_vm1 = vcmp.eq.s32.totalorder %v40_v16, %v43_v8 }
  0x78   :  { %v21_v7 = vmul.f32 1.442695, %v19_v6  ;;  %v49_v20 = vsel %vm47_vm1, %v19_v6, 0.0 }
  0x7a   :  { %105 = vpow2.f32 %v21_v7 }
  0x7d   :  { %v18_v9 = vpop.xlane.xlu0 %17  ;;  %v46_v15 = vpop.permute.xlu1 %45 }
  0x7e   :  { %v20_v10 = vsub.f32 %v12_v3, %v18_v9  ;;  %vm48_vm0 = vcmp.eq.s32.totalorder %v40_v16, %v46_v15 }
  0x80   :  { %v106_v11 = vpop.eup %105  ;;  %v23_v12 = vmul.f32 1.442695, %v20_v10  ;;  %v50_v19 = vsel %vm48_vm0, %v20_v10, 0.0 }
  0x81   :  { %25 = vadd.xlane.f32.xlu2 %v106_v11  ;;  %v29_v14 = vmul.f32 %v106_v11, %v19_v6 }
  0x82   :  { %107 = vpow2.f32 %v23_v12 }
  0x83   :  { %31 = vadd.xlane.f32.xlu0 %v29_v14 }
  0x88   :  { %v108_v17 = vpop.eup %107 }
  0x89   :  { %27 = vadd.xlane.f32.xlu2 %v108_v17  ;;  %v30_v18 = vmul.f32 %v108_v17, %v20_v10 }
  0x8b   :  { %53 = vadd.xlane.f32.xlu0 %v50_v19  ;;  %33 = vadd.xlane.f32.xlu1 %v30_v18 }
  0x91   :  { %51 = vadd.xlane.f32.xlu2 %v49_v20 }
  0xf4   :  { %v26_v21 = vpop.xlane.xlu2 %25 }
  0xf5   :  { %109 = vrcp.f32 %v26_v21  ;;  %v68_v26 = vand.u32 2147483648, %v26_v21  ;;  %v66_v28 = vand.u32 2147483647, %v26_v21  ;;  %vm62_vm3 = vweird.f32 %v26_v21 }
  0xf6   :  { %111 = vlog2.f32 %v26_v21  ;;  %v32_v33 = vpop.xlane.xlu0 %31 }
  0xf7   :  { %v69_v32 = vor.u32 1.1754944e-38, %v68_v26  ;;  %vm67_vm5 = vcmp.eq.f32.partialorder %v66_v28, 8.507059e+37 }
  0xfb   :  { %v110_v22 = vpop.eup %109 }
  0xfc   :  { %v58_v23 = vmul.f32 %v110_v22, %v26_v21  ;;  %v28_v24 = vpop.xlane.xlu2 %27  ;;  %vm63_vm2 = vweird.f32 %v110_v22  ;;  %v112_v29 = vpop.eup %111 }
  0xfd   :  { %113 = vrcp.f32 %v28_v24  ;;  %vm64_vm4 = vmor %vm62_vm3, %vm63_vm2  ;;  %v36_v34 = vmul.f32 0.6931472, %v112_v29  ;;  %v83_v43 = vand.u32 2147483648, %v28_v24  ;;  %v81_v46 = vand.u32 2147483647, %v28_v24 }
  0xfe   :  { %v59_v25 = vsub.f32 1.0, %v58_v23  ;;  %115 = vlog2.f32 %v28_v24  ;;  %vm77_vm7 = vweird.f32 %v28_v24  ;;  %v34_v55 = vpop.xlane.xlu1 %33  ;;  %v54_v56 = vpop.xlane.xlu0 %53 }
  0xff   :  { %v84_v51 = vor.u32 1.1754944e-38, %v83_v43  ;;  %vm82_vm10 = vcmp.eq.f32.partialorder %v81_v46, 8.507059e+37 }
 0x100   :  { %v60_v27 = vmul.f32 %v110_v22, %v59_v25 }
 0x102   :  { %v61_v30 = vadd.f32 %v110_v22, %v60_v27 }
 0x103   :  { %v114_v31 = vpop.eup %113 }
 0x104   :  { %v65_v35 = vsel %vm64_vm4, %v110_v22, %v61_v30  ;;  %v73_v36 = vmul.f32 %v114_v31, %v28_v24  ;;  %v52_v37 = vpop.xlane.xlu2 %51  ;;  %v116_v42 = vpop.eup %115  ;;  %vm78_vm6 = vweird.f32 %v114_v31 }
 0x105   :  { %v70_v38 = vsel %vm67_vm5, %v69_v32, %v65_v35  ;;  %v55_v41 = vsub.f32 %v36_v34, %v52_v37  ;;  %v38_v48 = vmul.f32 0.6931472, %v116_v42  ;;  %vm79_vm8 = vmor %vm77_vm7, %vm78_vm6 }
 0x106   :  { %v71_v39 = vmul.f32 %v70_v38, %v32_v33  ;;  %v74_v40 = vsub.f32 1.0, %v73_v36 }
 0x107   :  { %v89_v50 = vmul.f32 0.95, %v55_v41  ;;  %v56_v58 = vsub.f32 %v38_v48, %v54_v56 }
 0x108   :  { %v87_v44 = vsub.f32 %v71_v39, %v36_v34  ;;  %v75_v45 = vmul.f32 %v114_v31, %v74_v40 }
 0x109   :  { %v90_v61 = vmul.f32 0.95, %v56_v58 }
 0x10a   :  { %v91_v47 = vmul.f32 0.05, %v87_v44  ;;  %v76_v49 = vadd.f32 %v114_v31, %v75_v45 }
 0x10c   :  { %v80_v52 = vsel %vm79_vm8, %v114_v31, %v76_v49  ;;  %v93_v53 = vsub.f32 %v89_v50, %v91_v47 }
 0x10d   :  { %v85_v54 = vsel %vm82_vm10, %v84_v51, %v80_v52 }
 0x10e   :  { %v86_v57 = vmul.f32 %v85_v54, %v34_v55  ;;  %96 = vst.msk [vmem:[%s153_s2] sm:$0xff] %vm95_vm9, %v93_v53 }
 0x110   :  { %v88_v59 = vsub.f32 %v86_v57, %v38_v48 }
 0x112   :  { %v92_v60 = vmul.f32 0.05, %v88_v59 }
 0x114   :  { %v94_v62 = vsub.f32 %v90_v61, %v92_v60 }
 0x116   :  { %97 = vst.msk [vmem:[%s153_s2 + $0x8] sm:$0xff] %vm95_vm9, %v94_v62 }

</bundles_post_ra>
